<compile_context>
chip_gen: v7x
topology: tpu7x:2x2x1
jax: 0.10.0
libtpu: 0.0.40
codegen_flags: <defaults>
</compile_context>

<pallas_src>
import functools

import jax
import jax.numpy as jnp
from jax.experimental import pallas as pl
from jax.experimental.pallas import tpu as pltpu

_OUT_LANES = 128  # lane-dense output width; the real result lives in column 0


def _round_up(x, m):
    return ((x + m - 1) // m) * m


def mlp_kernel(x_ref, w1_ref, b1_ref, w2_ref, b2_ref, w3_ref, b3_ref, o_ref):
    # Layer 1: Linear(input_size -> 64) + ReLU (bf16 operands, f32 accumulate).
    h1 = jnp.dot(x_ref[...], w1_ref[...], preferred_element_type=jnp.float32)
    h1 = jnp.maximum(h1 + b1_ref[...], 0.0)
    # Layer 2: Linear(64 -> 32) + ReLU.
    h2 = jnp.dot(h1.astype(jnp.bfloat16), w2_ref[...],
                 preferred_element_type=jnp.float32)
    h2 = jnp.maximum(h2 + b2_ref[...], 0.0)
    # Layer 3: Linear(32 -> 128) (columns 1..127 of W3/b3 are zero padding).
    out = jnp.dot(h2.astype(jnp.bfloat16), w3_ref[...],
                  preferred_element_type=jnp.float32) + b3_ref[...]
    o_ref[...] = out.astype(o_ref.dtype)


@functools.partial(jax.jit, static_argnames=("block_m",))
def mlp_forward(x, w1, b1, w2, b2, w3, b3, *, block_m=512):
    """Fused 3-layer MLP forward pass. x: (batch, input_size) float32."""
    batch, in_features = x.shape

    # Big batch tile for HBM-roofline efficiency, capped at the (8-aligned)
    # batch so small batches are not massively over-padded.
    bm = min(block_m, _round_up(batch, 8))
    padded_batch = _round_up(batch, bm)
    if padded_batch != batch:
        x = jnp.pad(x, ((0, padded_batch - batch), (0, 0)))

    # Cast streamed matmul operands to bf16 (halves HBM traffic for x); biases
    # and accumulation stay f32.
    x_bf = x.astype(jnp.bfloat16)
    w1_bf = w1.astype(jnp.bfloat16)
    w2_bf = w2.astype(jnp.bfloat16)
    # Lane-dense output: zero-pad the final layer to 128 output lanes.
    w3_bf = jnp.zeros((w3.shape[0], _OUT_LANES), jnp.bfloat16)
    w3_bf = w3_bf.at[:, : w3.shape[1]].set(w3.astype(jnp.bfloat16))
    b3_p = jnp.zeros((1, _OUT_LANES), jnp.float32).at[:, : b3.shape[1]].set(b3)

    grid = (padded_batch // bm,)

    # Weights / biases are tiny: replicate the full tensors to every grid step.
    def rep(arr):
        ndim = arr.ndim
        return pl.BlockSpec(arr.shape, lambda i, _n=ndim: (0,) * _n)

    # VMEM budget: double-buffered x tile + double-buffered output tile +
    # replicated weights, with headroom. Capped at 48 MiB (v7x has 64 MiB
    # physical VMEM).
    x_tile_bytes = bm * in_features * 2
    out_tile_bytes = bm * _OUT_LANES * 4
    vmem_limit = int(min(
        48 * 1024 * 1024,
        max(32 * 1024 * 1024, 4 * (x_tile_bytes + out_tile_bytes) + (2 << 20)),
    ))

    flops = 2 * padded_batch * (in_features * 64 + 64 * 32 + 32 * _OUT_LANES)
    bytes_accessed = (
        padded_batch * in_features * 2          # x (bf16)
        + padded_batch * _OUT_LANES * 4         # output (f32)
        + (in_features * 64 + 64 * 32 + 32 * _OUT_LANES) * 2  # weights (bf16)
        + (64 + 32 + _OUT_LANES) * 4            # biases (f32)
    )

    out_padded = pl.pallas_call(
        mlp_kernel,
        out_shape=jax.ShapeDtypeStruct((padded_batch, _OUT_LANES), jnp.float32),
        grid_spec=pltpu.PrefetchScalarGridSpec(
            num_scalar_prefetch=0,
            grid=grid,
            in_specs=[
                pl.BlockSpec((bm, in_features), lambda i: (i, 0)),  # x tile
                rep(w1_bf), rep(b1),
                rep(w2_bf), rep(b2),
                rep(w3_bf), rep(b3_p),
            ],
            out_specs=pl.BlockSpec((bm, _OUT_LANES), lambda i: (i, 0)),
        ),
        compiler_params=pltpu.CompilerParams(
            dimension_semantics=("parallel",),
            vmem_limit_bytes=vmem_limit,
        ),
        cost_estimate=pl.CostEstimate(
            flops=flops, transcendentals=0, bytes_accessed=bytes_accessed),
    )(x_bf, w1_bf, b1, w2_bf, b2, w3_bf, b3_p)

    # Strip batch padding and lane padding; column 0 holds the real output.
    return out_padded[:batch, :1].astype(x.dtype)


def init_params(key, input_size):
    """Deterministic PyTorch-style (uniform +/- 1/sqrt(fan_in)) init."""
    dims = [(input_size, 64), (64, 32), (32, 1)]
    params = []
    for (fan_in, fan_out) in dims:
        key, kw, kb = jax.random.split(key, 3)
        bound = 1.0 / jnp.sqrt(fan_in)
        w = jax.random.uniform(kw, (fan_in, fan_out), jnp.float32, -bound, bound)
        b = jax.random.uniform(kb, (1, fan_out), jnp.float32, -bound, bound)
        params += [w, b]
    return params


if __name__ == "__main__":
    key = jax.random.PRNGKey(0)
    batch, input_size = 8, 32

    key, kx = jax.random.split(key)
    x = jax.random.normal(kx, (batch, input_size), dtype=jnp.float32)

    w1, b1, w2, b2, w3, b3 = init_params(key, input_size)

    out = mlp_forward(x, w1, b1, w2, b2, w3, b3)
    out = jax.block_until_ready(out)

    # Pure-JAX f32 reference (kernel uses bf16 matmul operands -> loose tol).
    def ref(xx):
        h1 = jnp.maximum(xx @ w1 + b1, 0.0)
        h2 = jnp.maximum(h1 @ w2 + b2, 0.0)
        return h2 @ w3 + b3

    expected = ref(x)
    assert out.shape == (batch, 1), out.shape
    assert jnp.allclose(out, expected, atol=3e-2, rtol=3e-2), (
        float(jnp.max(jnp.abs(out - expected))))

    # Ragged batch (not a multiple of the tile) exercises the padding path.
    xr = jax.random.normal(jax.random.PRNGKey(1), (10, input_size), jnp.float32)
    outr = jax.block_until_ready(mlp_forward(xr, w1, b1, w2, b2, w3, b3))
    assert outr.shape == (10, 1), outr.shape
    assert jnp.allclose(outr, ref(xr), atol=3e-2, rtol=3e-2)

    print("KERNEL_OK")
</pallas_src>

<mosaic_0001>
module attributes {stable_mosaic.version = 11 : i64} {
  func.func @mlp_kernel(%arg0: i32, %arg1: memref<8x32xbf16, #tpu.memory_space<vmem>>, %arg2: memref<32x64xbf16, #tpu.memory_space<vmem>>, %arg3: memref<1x64xf32, #tpu.memory_space<vmem>>, %arg4: memref<64x32xbf16, #tpu.memory_space<vmem>>, %arg5: memref<1x32xf32, #tpu.memory_space<vmem>>, %arg6: memref<32x128xbf16, #tpu.memory_space<vmem>>, %arg7: memref<1x128xf32, #tpu.memory_space<vmem>>, %arg8: memref<8x128xf32, #tpu.memory_space<vmem>>) attributes {dimension_semantics = [#tpu.dimension_semantics<parallel>], iteration_bounds = array<i64: 1>, scalar_prefetch = 0 : i64, scratch_operands = 0 : i64, tpu.core_type = #tpu.core_type<tc>, window_params = [{transform_indices = @transform_0, window_bounds = array<i64: 8, 32>}, {pipeline_mode = #tpu.pipeline_mode<synchronous>, transform_indices = @transform_1, window_bounds = array<i64: 32, 64>}, {pipeline_mode = #tpu.pipeline_mode<synchronous>, transform_indices = @transform_2, window_bounds = array<i64: 1, 64>}, {pipeline_mode = #tpu.pipeline_mode<synchronous>, transform_indices = @transform_3, window_bounds = array<i64: 64, 32>}, {pipeline_mode = #tpu.pipeline_mode<synchronous>, transform_indices = @transform_4, window_bounds = array<i64: 1, 32>}, {pipeline_mode = #tpu.pipeline_mode<synchronous>, transform_indices = @transform_5, window_bounds = array<i64: 32, 128>}, {pipeline_mode = #tpu.pipeline_mode<synchronous>, transform_indices = @transform_6, window_bounds = array<i64: 1, 128>}, {transform_indices = @transform_7, window_bounds = array<i64: 8, 128>}]} {
    %c0 = arith.constant 0 : index
    %c0_0 = arith.constant 0 : index
    %0 = vector.load %arg1[%c0, %c0_0] : memref<8x32xbf16, #tpu.memory_space<vmem>>, vector<8x32xbf16>
    %c0_1 = arith.constant 0 : index
    %c0_2 = arith.constant 0 : index
    %1 = vector.load %arg2[%c0_1, %c0_2] : memref<32x64xbf16, #tpu.memory_space<vmem>>, vector<32x64xbf16>
    %cst = arith.constant dense<0.000000e+00> : vector<8x64xf32>
    %2 = tpu.matmul %0, %1, %cst {dimension_numbers = #tpu.dot_dimension_numbers<[1], [0], [0], [1], [0, 0, 1, 1], [], []>} : vector<8x32xbf16>, vector<32x64xbf16>, vector<8x64xf32> -> vector<8x64xf32>
    %c0_3 = arith.constant 0 : index
    %c0_4 = arith.constant 0 : index
    %3 = vector.load %arg3[%c0_3, %c0_4] : memref<1x64xf32, #tpu.memory_space<vmem>>, vector<1x64xf32>
    %4 = vector.broadcast %3 : vector<1x64xf32> to vector<8x64xf32>
    %5 = arith.addf %2, %4 : vector<8x64xf32>
    %cst_5 = arith.constant 0.000000e+00 : f32
    %6 = vector.broadcast %cst_5 : f32 to vector<8x64xf32>
    %7 = arith.maximumf %5, %6 : vector<8x64xf32>
    %8 = arith.truncf %7 : vector<8x64xf32> to vector<8x64xbf16>
    %c0_6 = arith.constant 0 : index
    %c0_7 = arith.constant 0 : index
    %9 = vector.load %arg4[%c0_6, %c0_7] : memref<64x32xbf16, #tpu.memory_space<vmem>>, vector<64x32xbf16>
    %cst_8 = arith.constant dense<0.000000e+00> : vector<8x32xf32>
    %10 = tpu.matmul %8, %9, %cst_8 {dimension_numbers = #tpu.dot_dimension_numbers<[1], [0], [0], [1], [0, 0, 1, 1], [], []>} : vector<8x64xbf16>, vector<64x32xbf16>, vector<8x32xf32> -> vector<8x32xf32>
    %c0_9 = arith.constant 0 : index
    %c0_10 = arith.constant 0 : index
    %11 = vector.load %arg5[%c0_9, %c0_10] : memref<1x32xf32, #tpu.memory_space<vmem>>, vector<1x32xf32>
    %12 = vector.broadcast %11 : vector<1x32xf32> to vector<8x32xf32>
    %13 = arith.addf %10, %12 : vector<8x32xf32>
    %cst_11 = arith.constant 0.000000e+00 : f32
    %14 = vector.broadcast %cst_11 : f32 to vector<8x32xf32>
    %15 = arith.maximumf %13, %14 : vector<8x32xf32>
    %16 = arith.truncf %15 : vector<8x32xf32> to vector<8x32xbf16>
    %c0_12 = arith.constant 0 : index
    %c0_13 = arith.constant 0 : index
    %17 = vector.load %arg6[%c0_12, %c0_13] : memref<32x128xbf16, #tpu.memory_space<vmem>>, vector<32x128xbf16>
    %cst_14 = arith.constant dense<0.000000e+00> : vector<8x128xf32>
    %18 = tpu.matmul %16, %17, %cst_14 {dimension_numbers = #tpu.dot_dimension_numbers<[1], [0], [0], [1], [0, 0, 1, 1], [], []>} : vector<8x32xbf16>, vector<32x128xbf16>, vector<8x128xf32> -> vector<8x128xf32>
    %c0_15 = arith.constant 0 : index
    %c0_16 = arith.constant 0 : index
    %19 = vector.load %arg7[%c0_15, %c0_16] : memref<1x128xf32, #tpu.memory_space<vmem>>, vector<1x128xf32>
    %20 = vector.broadcast %19 : vector<1x128xf32> to vector<8x128xf32>
    %21 = arith.addf %18, %20 : vector<8x128xf32>
    %c0_17 = arith.constant 0 : index
    %c0_18 = arith.constant 0 : index
    %22 = vector.load %arg8[%c0_17, %c0_18] : memref<8x128xf32, #tpu.memory_space<vmem>>, vector<8x128xf32>
    tpu.vector_store %arg8[%c0_17, %c0_18], %21 {strides = array<i32>} : memref<8x128xf32, #tpu.memory_space<vmem>>, vector<8x128xf32>,
    return
  }
  func.func @transform_0(%arg0: i32) -> (i32, i32) {
    %c0_i32 = arith.constant 0 : i32
    %c0_i32_0 = arith.constant 0 : i32
    return %arg0, %c0_i32 : i32, i32
  }
  func.func @transform_1(%arg0: i32) -> (i32, i32) {
    %c0_i32 = arith.constant 0 : i32
    %c0_i32_0 = arith.constant 0 : i32
    %c0_i32_1 = arith.constant 0 : i32
    return %c0_i32, %c0_i32_0 : i32, i32
  }
  func.func @transform_2(%arg0: i32) -> (i32, i32) {
    %c0_i32 = arith.constant 0 : i32
    %c0_i32_0 = arith.constant 0 : i32
    %c0_i32_1 = arith.constant 0 : i32
    return %c0_i32, %c0_i32_0 : i32, i32
  }
  func.func @transform_3(%arg0: i32) -> (i32, i32) {
    %c0_i32 = arith.constant 0 : i32
    %c0_i32_0 = arith.constant 0 : i32
    %c0_i32_1 = arith.constant 0 : i32
    return %c0_i32, %c0_i32_0 : i32, i32
  }
  func.func @transform_4(%arg0: i32) -> (i32, i32) {
    %c0_i32 = arith.constant 0 : i32
    %c0_i32_0 = arith.constant 0 : i32
    %c0_i32_1 = arith.constant 0 : i32
    return %c0_i32, %c0_i32_0 : i32, i32
  }
  func.func @transform_5(%arg0: i32) -> (i32, i32) {
    %c0_i32 = arith.constant 0 : i32
    %c0_i32_0 = arith.constant 0 : i32
    %c0_i32_1 = arith.constant 0 : i32
    return %c0_i32, %c0_i32_0 : i32, i32
  }
  func.func @transform_6(%arg0: i32) -> (i32, i32) {
    %c0_i32 = arith.constant 0 : i32
    %c0_i32_0 = arith.constant 0 : i32
    %c0_i32_1 = arith.constant 0 : i32
    return %c0_i32, %c0_i32_0 : i32, i32
  }
  func.func @transform_7(%arg0: i32) -> (i32, i32) {
    %c0_i32 = arith.constant 0 : i32
    %c0_i32_0 = arith.constant 0 : i32
    return %arg0, %c0_i32 : i32, i32
  }
}

</mosaic_0001>

<bundles_post_ra>
// kernel: mlp_forward.1
= control target key start
LH: loop header
LB: loop body
LE: loop exit
PB: predicated region body
PF: predicated region fallthrough
CT: control target
= control target key end

     0   :  { %v316_v0 = vmov 0.0   ;;  %vm317_vm0 = vmmov 0   ;;  %vm51_vm1 = vcmask 261120   ;;  %vm136_vm2 = vcmask 523264   ;;  %s402_s1 = inlined_call_operand.vmem [shape: bf16[32,64], index: 1, kind: input, shape index: {}]   ;;  %s403_s3 = inlined_call_operand.vmem [shape: bf16[64,32], index: 3, kind: input, shape index: {}]   ;;  %s404_s0 = inlined_call_operand.vmem [shape: bf16[8,32], index: 0, kind: input, shape index: {}]   ;;  %s405_s5 = inlined_call_operand.vmem [shape: bf16[32,128], index: 5, kind: input, shape index: {}]   ;;  %s406_s2 = inlined_call_operand.vmem [shape: f32[1,64], index: 2, kind: input, shape index: {}]   ;;  %s407_s4 = inlined_call_operand.vmem [shape: f32[1,32], index: 4, kind: input, shape index: {}]   ;;  %s408_s6 = inlined_call_operand.vmem [shape: f32[1,128], index: 6, kind: input, shape index: {}]   ;;  %s409_s7 = inlined_call_operand.vmem [shape: f32[8,128], index: 7, kind: output, shape index: {}]  }
   0x1   :  { %278 = vmatprep.subr.bf16.mxu0 %v316_v0  ;;  %v308_v1 = vld [vmem:[%s402_s1] sm:$0xff]   ;;  %282 = vmatprep.mubr.msk.bf16.mxu0 %vm317_vm0, %v316_v0  ;;  %v309_v2 = vld [vmem:[%s402_s1 + $0x8] sm:$0xff]   ;;  %v312_v6 = vld [vmem:[%s403_s3 + $0x10] sm:$0xff]  }
   0x2   :  { %286 = vmatprep.subr.bf16.mxu1 %v316_v0  ;;  %294 = vmatprep.mubr.msk.bf16.mxu1 %vm317_vm0, %v316_v0  ;;  %v310_v3 = vld [vmem:[%s403_s3] sm:$0xff]   ;;  %v311_v4 = vld [vmem:[%s403_s3 + $0x8] sm:$0xff]   ;;  %v313_v7 = vld [vmem:[%s403_s3 + $0x18] sm:$0xff]  }
   0x3   :  { %279 = vmatpush3.bf16.msra.mxu0 %v308_v1  ;;  %287 = vmatpush3.bf16.msra.mxu1 %v310_v3  ;;  %v27_v5 = vld [vmem:[%s404_s0] sm:$0xf]  ;;  %v315_v17 = vld [vmem:[%s405_s5 + $0x8] sm:$0xff]  }
   0x4   :  { %280 = vmatprep.subr.bf16.mxu0 %v316_v0  ;;  %288 = vmatprep.subr.bf16.mxu1 %v316_v0  ;;  %v314_v8 = vld [vmem:[%s405_s5] sm:$0xff]  }
   0x5   :  { %v253_v9 = vld [vmem:[%s406_s2] ss:$0 sm:$0xff] }
   0x6   :  { %v257_v18 = vld [vmem:[%s407_s4] ss:$0 sm:$0xff] }
   0x7   :  { %281 = vmatpush3.bf16.msra.mxu0 %v309_v2  ;;  %289 = vmatpush3.bf16.msra.mxu1 %v311_v4  ;;  %v263_v26 = vld [vmem:[%s408_s6] ss:$0 sm:$0xff] }
   0x8   :  { %298 = vmatprep.subr.bf16.mxu0 %v316_v0  ;;  %290 = vmatprep.subr.bf16.mxu1 %v316_v0 }
   0xa   :  { %283 = vmatmul.mubr.msk.bf16.vlgmr.msra.gmra.mrb[0].mxu0 %vm51_vm1, %v27_v5 }
   0xb   :  { %302 = vmatprep.mubr.msk.bf16.mxu0 %vm317_vm0, %v316_v0  ;;  %291 = vmatpush3.bf16.msra.mxu1 %v312_v6 }
   0xc   :  { %292 = vmatprep.subr.bf16.mxu1 %v316_v0  ;;  %299 = vmatpush3.bf16.msra.mxu0 %v314_v8 }
   0xd   :  { %300 = vmatprep.subr.bf16.mxu0 %v316_v0 }
   0xf   :  { %293 = vmatpush3.bf16.msra.mxu1 %v313_v7 }
  0x10   :  { %301 = vmatpush3.bf16.msra.mxu0 %v315_v17 }
  0xdd   :  { %v89_v10 = vpop.f32.mrb[0].mxu0 }
  0xde   :  { %v90_v11 = vadd.f32 %v253_v9, %v89_v10  ;;  %v284_v12 = vpop.f32.mrb[1].mxu0 }
  0xdf   :  { %v92_v13 = vpop.f32.mrb[2].mxu0 }
  0xe0   :  { %v95_v14 = vmax.f32 %v90_v11, 0.0  ;;  %v285_v15 = vpop.f32.mrb[3].mxu0 }
  0xe2   :  { %v96_v16 = vpack.c.bf16 %v95_v14, %v95_v14 }
  0xe4   :  { %295 = vmatmul.mubr.msk.bf16.vlgmr.msra.gmra.mrb[0].mxu1 %vm136_vm2, %v96_v16 }
 0x1b7   :  { %v174_v19 = vpop.f32.mrb[0].mxu1 }
 0x1b8   :  { %v175_v20 = vadd.f32 %v257_v18, %v174_v19  ;;  %v296_v21 = vpop.f32.mrb[1].mxu1 }
 0x1b9   :  { %v177_v22 = vpop.f32.mrb[2].mxu1 }
 0x1ba   :  { %v180_v23 = vmax.f32 %v175_v20, 0.0  ;;  %v297_v24 = vpop.f32.mrb[3].mxu1 }
 0x1bc   :  { %v181_v25 = vpack.c.bf16 %v180_v23, %v180_v23 }
 0x1be   :  { %303 = vmatmul.mubr.msk.bf16.vlgmr.msra.gmra.mrb[4].mxu0 %vm51_vm1, %v181_v25 }
 0x291   :  { %v242_v27 = vpop.f32.mrb[4].mxu0 }
 0x292   :  { %v243_v28 = vadd.f32 %v263_v26, %v242_v27  ;;  %v304_v29 = vpop.f32.mrb[5].mxu0 }
 0x293   :  { %v245_v30 = vpop.f32.mrb[6].mxu0 }
 0x294   :  { %248 = vst [vmem:[%s409_s7] sm:$0xff] %v243_v28  ;;  %v305_v31 = vpop.f32.mrb[7].mxu0 }

</bundles_post_ra>
